<compile_context>
chip_gen: v7x
topology: tpu7x:2x2x1
jax: 0.10.0
libtpu: 0.0.40
codegen_flags: <defaults>
</compile_context>

<pallas_src>
import functools

import jax
import jax.numpy as jnp
from jax import lax
from jax.experimental import pallas as pl
from jax.experimental.pallas import tpu as pltpu

KMAX = 7
PAD = (KMAX - 1) // 2  # 3


def _fused_weight_hwio(w3, w5, w7):
    """Fuse 3x3/5x5/7x7 OIHW weights into one zero-padded 7x7 HWIO weight (exact)."""
    def to_hwio(w):  # (Cout, Cin, k, k) -> (k, k, Cin, Cout)
        return jnp.transpose(w, (2, 3, 1, 0))
    return (to_hwio(w7)
            + jnp.pad(to_hwio(w5), ((1, 1), (1, 1), (0, 0), (0, 0)))
            + jnp.pad(to_hwio(w3), ((2, 2), (2, 2), (0, 0), (0, 0))))


def _banded_weight(w_fused_hwio, W, compute_dtype):
    """Fold kx and the width axis into the weight.

    Returns w_all of shape ((W+6)*Cin, 7*W*Cout) with
      w_all[w'*Cin + c, ky*(W*Cout) + w*Cout + co] = wf[ky, w'-w, c, co]  (0<=w'-w<7, else 0)
    so that  P = xflat @ w_all  gives per-ky partial conv outputs and only 7
    statically-shifted adds over ky remain in the kernel.
    """
    Cin, Cout = w_fused_hwio.shape[2], w_fused_hwio.shape[3]
    Wp = W + 2 * PAD
    kx_rel = jnp.arange(Wp)[None, :] - jnp.arange(W)[:, None]          # (W, Wp): w' - w
    mask = ((kx_rel >= 0) & (kx_rel < KMAX)).astype(w_fused_hwio.dtype)
    taps = w_fused_hwio[:, jnp.clip(kx_rel, 0, KMAX - 1)]               # (7, W, Wp, Cin, Cout)
    taps = taps * mask[None, :, :, None, None]
    # -> (w', c, ky, w, co) -> (Wp*Cin, 7*W*Cout)
    w_all = jnp.transpose(taps, (2, 3, 0, 1, 4)).reshape(Wp * Cin, KMAX * W * Cout)
    return w_all.astype(compute_dtype)


def _muticonv_kernel(x_ref, w_ref, o_ref):
    # x_ref : (1, tile_h + 6, (W+6)*Cin)   halo'd, lane-flattened input tile
    # w_ref : ((W+6)*Cin, 7*W*Cout)        banded fused weight
    # o_ref : (1, tile_h, W*Cout)          lane-dense output tile
    tile_h = o_ref.shape[1]
    WC = o_ref.shape[2]                    # W * Cout

    xf = x_ref[0]                          # (ht, (W+6)*Cin)
    # Single MXU matmul per tile: K = (W+6)*Cin, N = 7*W*Cout, f32 accumulation.
    p = jnp.dot(xf, w_ref[...], preferred_element_type=jnp.float32)   # (ht, 7*WC)

    # Fold the 7 ky taps: statically shifted row/lane slices, summed in f32.
    acc = p[0:tile_h, 0:WC]
    for ky in range(1, KMAX):
        acc = acc + p[ky:ky + tile_h, ky * WC:(ky + 1) * WC]
    o_ref[0] = acc.astype(o_ref.dtype)


def _pick_tile_h(H, W, Cin, Cout):
    """Whole image per grid step when it fits a conservative VMEM budget."""
    budget = 8 << 20
    per_row = (KMAX * W * Cout * 4            # f32 matmul result row
               + (W + 2 * PAD) * Cin * 2 * 2  # bf16 input row, double-buffered
               + W * Cout * 4)                # output row
    rows = max(8, budget // max(per_row, 1))
    if H <= rows:
        return H
    n = pl.cdiv(H, rows)
    return pl.cdiv(H, n)


@functools.partial(jax.jit, static_argnames=("tile_h", "compute_dtype"))
def muticonv_pallas(x_nchw, w3, w5, w7, *, tile_h=None,
                    compute_dtype=jnp.bfloat16):
    """Sum of 3x3/5x5/7x7 'same' convs (no bias). x: (N,Cin,H,W); w_k: (Cout,Cin,k,k)."""
    N, Cin, H, W = x_nchw.shape
    Cout = w7.shape[0]
    out_dtype = x_nchw.dtype
    Wp = W + 2 * PAD

    if tile_h is None:
        tile_h = _pick_tile_h(H, W, Cin, Cout)
    n_th = pl.cdiv(H, tile_h)
    h_pad = n_th * tile_h
    ht = tile_h + 2 * PAD

    # Fused + banded weight (built once, in f32, then cast).
    # TODO(synk): for very wide images, tile W as well so the banded weight stays small.
    w_fused = _fused_weight_hwio(w3, w5, w7)
    w_all = _banded_weight(w_fused, W, compute_dtype)          # (Wp*Cin, 7*W*Cout)

    # NCHW -> NHWC, halo pad, flatten (W, Cin) into one lane-dense axis.
    x = jnp.transpose(x_nchw, (0, 2, 3, 1)).astype(compute_dtype)
    x_pad = jnp.pad(x, ((0, 0), (PAD, PAD + h_pad - H), (PAD, PAD), (0, 0)))
    x_pad = x_pad.reshape(N, h_pad + 2 * PAD, Wp * Cin)
    if n_th == 1:
        x_tiles = x_pad                                        # no staging copy
    else:
        # TODO(synk): express the overlapping H windows with pl.Element offsets
        # instead of this halo-duplicating staging copy for large H.
        x_tiles = jnp.stack(
            [x_pad[:, t * tile_h:t * tile_h + ht] for t in range(n_th)], axis=1)
        x_tiles = x_tiles.reshape(N * n_th, ht, Wp * Cin)

    out_tiled = pl.pallas_call(
        _muticonv_kernel,
        out_shape=jax.ShapeDtypeStruct((N * n_th, tile_h, W * Cout), out_dtype),
        grid_spec=pltpu.PrefetchScalarGridSpec(
            num_scalar_prefetch=0,
            grid=(N * n_th,),
            in_specs=[
                pl.BlockSpec((1, ht, Wp * Cin), lambda i: (i, 0, 0)),
                pl.BlockSpec((Wp * Cin, KMAX * W * Cout), lambda i: (0, 0)),
            ],
            out_specs=pl.BlockSpec((1, tile_h, W * Cout), lambda i: (i, 0, 0)),
        ),
        compiler_params=pltpu.CompilerParams(
            dimension_semantics=("parallel",),
            vmem_limit_bytes=48 * 1024 * 1024,
        ),
    )(x_tiles, w_all)

    out = out_tiled.reshape(N, h_pad, W, Cout)[:, :H]          # drop H-padding rows
    return jnp.transpose(out, (0, 3, 1, 2))                    # NHWC -> NCHW


def _reference_f32(x_nchw, w3, w5, w7):
    """Pure-JAX module-semantics reference: three f32 'same' convs summed (NCHW)."""
    out = None
    for w in (w3, w5, w7):
        k = w.shape[-1]
        p = (k - 1) // 2
        y = lax.conv_general_dilated(
            x_nchw, w, window_strides=(1, 1), padding=[(p, p), (p, p)],
            dimension_numbers=("NCHW", "OIHW", "NCHW"),
            precision=lax.Precision.HIGHEST,
            preferred_element_type=jnp.float32)
        out = y if out is None else out + y
    return out


def _reference_matched(x_nchw, w3, w5, w7, compute_dtype):
    """Apples-to-apples reference: single 7x7 conv with the SAME fused weight,
    operands rounded to compute_dtype, f32 accumulation."""
    wf = _fused_weight_hwio(w3, w5, w7).astype(compute_dtype)      # (7,7,Cin,Cout)
    xh = jnp.transpose(x_nchw, (0, 2, 3, 1)).astype(compute_dtype)
    y = lax.conv_general_dilated(
        xh, wf, window_strides=(1, 1), padding=[(PAD, PAD), (PAD, PAD)],
        dimension_numbers=("NHWC", "HWIO", "NHWC"),
        preferred_element_type=jnp.float32)
    return jnp.transpose(y, (0, 3, 1, 2))


if __name__ == "__main__":
    key = jax.random.PRNGKey(0)
    N, Cin, H, W = 2, 4, 16, 16
    Cout = 8

    k_x, k3, k5, k7 = jax.random.split(key, 4)
    x = jax.random.normal(k_x, (N, Cin, H, W), jnp.float32)
    w3 = jax.random.normal(k3, (Cout, Cin, 3, 3), jnp.float32) * 0.1
    w5 = jax.random.normal(k5, (Cout, Cin, 5, 5), jnp.float32) * 0.1
    w7 = jax.random.normal(k7, (Cout, Cin, 7, 7), jnp.float32) * 0.1

    out = muticonv_pallas(x, w3, w5, w7)
    out = jax.block_until_ready(out)
    assert out.shape == (N, Cout, H, W), out.shape

    # Tight check vs the matched reference (same fused bf16 weight, f32 accum):
    # differences are only f32 summation-order reassociation.
    ref_m = _reference_matched(x, w3, w5, w7, jnp.bfloat16)
    err_m = float(jnp.max(jnp.abs(out - ref_m)))
    assert jnp.allclose(out, ref_m, atol=2e-3, rtol=2e-3), err_m

    # Loose sanity check vs the full-f32 module semantics (bf16 operand rounding).
    ref_f32 = _reference_f32(x, w3, w5, w7)
    err_f32 = float(jnp.max(jnp.abs(out - ref_f32)))
    assert jnp.allclose(out, ref_f32, atol=1e-1, rtol=1e-1), err_f32

    print("KERNEL_OK")
</pallas_src>

<mosaic_0001>
module attributes {stable_mosaic.version = 11 : i64} {
  func.func @_muticonv_kernel(%arg0: i32, %arg1: memref<1x22x88xbf16, #tpu.memory_space<vmem>>, %arg2: memref<88x896xbf16, #tpu.memory_space<vmem>>, %arg3: memref<1x16x128xf32, #tpu.memory_space<vmem>>) attributes {dimension_semantics = [#tpu.dimension_semantics<parallel>], iteration_bounds = array<i64: 2>, scalar_prefetch = 0 : i64, scratch_operands = 0 : i64, tpu.core_type = #tpu.core_type<tc>, window_params = [{transform_indices = @transform_0, window_bounds = array<i64: 1, 22, 88>}, {pipeline_mode = #tpu.pipeline_mode<synchronous>, transform_indices = @transform_1, window_bounds = array<i64: 88, 896>}, {transform_indices = @transform_2, window_bounds = array<i64: 1, 16, 128>}]} {
    %c0 = arith.constant 0 : index
    %c0_0 = arith.constant 0 : index
    %c0_1 = arith.constant 0 : index
    %0 = vector.load %arg1[%c0, %c0_0, %c0_1] : memref<1x22x88xbf16, #tpu.memory_space<vmem>>, vector<1x22x88xbf16>
    %1 = vector.shape_cast %0 : vector<1x22x88xbf16> to vector<22x88xbf16>
    %c0_2 = arith.constant 0 : index
    %c0_3 = arith.constant 0 : index
    %2 = vector.load %arg2[%c0_2, %c0_3] : memref<88x896xbf16, #tpu.memory_space<vmem>>, vector<88x896xbf16>
    %cst = arith.constant dense<0.000000e+00> : vector<22x896xf32>
    %3 = tpu.matmul %1, %2, %cst {dimension_numbers = #tpu.dot_dimension_numbers<[1], [0], [0], [1], [0, 0, 1, 1], [], []>} : vector<22x88xbf16>, vector<88x896xbf16>, vector<22x896xf32> -> vector<22x896xf32>
    %4 = vector.extract_strided_slice %3 {offsets = [0, 0], sizes = [16, 128], strides = [1, 1]} : vector<22x896xf32> to vector<16x128xf32>
    %5 = vector.extract_strided_slice %3 {offsets = [1, 128], sizes = [16, 128], strides = [1, 1]} : vector<22x896xf32> to vector<16x128xf32>
    %6 = arith.addf %4, %5 : vector<16x128xf32>
    %7 = vector.extract_strided_slice %3 {offsets = [2, 256], sizes = [16, 128], strides = [1, 1]} : vector<22x896xf32> to vector<16x128xf32>
    %8 = arith.addf %6, %7 : vector<16x128xf32>
    %9 = vector.extract_strided_slice %3 {offsets = [3, 384], sizes = [16, 128], strides = [1, 1]} : vector<22x896xf32> to vector<16x128xf32>
    %10 = arith.addf %8, %9 : vector<16x128xf32>
    %11 = vector.extract_strided_slice %3 {offsets = [4, 512], sizes = [16, 128], strides = [1, 1]} : vector<22x896xf32> to vector<16x128xf32>
    %12 = arith.addf %10, %11 : vector<16x128xf32>
    %13 = vector.extract_strided_slice %3 {offsets = [5, 640], sizes = [16, 128], strides = [1, 1]} : vector<22x896xf32> to vector<16x128xf32>
    %14 = arith.addf %12, %13 : vector<16x128xf32>
    %15 = vector.extract_strided_slice %3 {offsets = [6, 768], sizes = [16, 128], strides = [1, 1]} : vector<22x896xf32> to vector<16x128xf32>
    %16 = arith.addf %14, %15 : vector<16x128xf32>
    %c0_4 = arith.constant 0 : index
    %c0_5 = arith.constant 0 : index
    %c0_6 = arith.constant 0 : index
    %17 = vector.load %arg3[%c0_4, %c0_5, %c0_6] : memref<1x16x128xf32, #tpu.memory_space<vmem>>, vector<1x16x128xf32>
    %18 = vector.shape_cast %17 : vector<1x16x128xf32> to vector<16x128xf32>
    %19 = vector.shape_cast %16 : vector<16x128xf32> to vector<1x16x128xf32>
    tpu.vector_store %arg3[%c0_4, %c0_5, %c0_6], %19 {strides = array<i32>} : memref<1x16x128xf32, #tpu.memory_space<vmem>>, vector<1x16x128xf32>,
    return
  }
  func.func @transform_0(%arg0: i32) -> (i32, i32, i32) {
    %c0_i32 = arith.constant 0 : i32
    %c0_i32_0 = arith.constant 0 : i32
    %c0_i32_1 = arith.constant 0 : i32
    return %arg0, %c0_i32, %c0_i32_0 : i32, i32, i32
  }
  func.func @transform_1(%arg0: i32) -> (i32, i32) {
    %c0_i32 = arith.constant 0 : i32
    %c0_i32_0 = arith.constant 0 : i32
    %c0_i32_1 = arith.constant 0 : i32
    return %c0_i32, %c0_i32_0 : i32, i32
  }
  func.func @transform_2(%arg0: i32) -> (i32, i32, i32) {
    %c0_i32 = arith.constant 0 : i32
    %c0_i32_0 = arith.constant 0 : i32
    %c0_i32_1 = arith.constant 0 : i32
    return %arg0, %c0_i32, %c0_i32_0 : i32, i32, i32
  }
}

</mosaic_0001>

<bundles_post_ra>
// kernel: muticonv_pallas.1
= control target key start
LH: loop header
LB: loop body
LE: loop exit
PB: predicated region body
PF: predicated region fallthrough
CT: control target
= control target key end

     0   :  { %s945_s9 = smov 0   ;;  %s1119_s0 = inlined_call_operand.vmem [shape: bf16[2,22,88], index: 0, kind: input, shape index: {}]   ;;  %s1120_s1 = inlined_call_operand.vmem [shape: bf16[88,896], index: 1, kind: input, shape index: {}]   ;;  %s1121_s2 = inlined_call_operand.vmem [shape: f32[2,16,128], index: 2, kind: output, shape index: {}]  }
   0x1 LB: > { %s761_s10 = sadd.s32 4294967295, %s927_s9   ;;  %p765_p0 = scmp.ge.s32.totalorder %s927_s9, 1  ;;  %s927_s9 = sphi %s945_s9, %s12_s9  }
   0x2   : > { %p112_p1 = scmp.lt.s32.totalorder %s927_s9, 3 }
   0x4   : > { %p113_p2 = pnand %p765_p0, %p112_p1 }
   0x5   : > { %v862_v0 = vld [vmem:[%s1120_s1 + $0x4] ss:$28 sps:$4 sm:$0xff] (!%p113_p2)   ;;  %v929_v2 = vmov (!%p113_p2), 0   ;;  %p134_p3 = scmp.lt.s32.totalorder (!%p113_p2), %s761_s10, 1  ;;  %v865_v3 = vld [vmem:[%s1120_s1 + $0xc] ss:$28 sps:$4 sm:$0xff] (!%p113_p2)  }
   0x6   : > { %116 = sbr.rel (%p113_p2) target bundleno = 285 (0x11d), region = 28  ;;  %v864_v1 = vld [vmem:[%s1120_s1] ss:$28 sps:$4 sm:$0xff] (!%p113_p2)   ;;  %459 = vmatprep.mubr.bf16.mxu0 (!%p113_p2), %v929_v2  ;;  %509 = vmatprep.mubr.bf16.mxu1 (!%p113_p2), %v929_v2  ;;  %v867_v4 = vld [vmem:[%s1120_s1 + $0x8] ss:$28 sps:$4 sm:$0xff] (!%p113_p2)   ;;  %vm405_vm0 = vcmask (!%p113_p2), 1043456  }
   0x7   : > { %427 = vmatprep.subr.bf16.mxu0 (!%p113_p2), %v862_v0  ;;  %v868_v5 = vld [vmem:[%s1120_s1 + $0x3c] ss:$28 sps:$4 sm:$0xff] (!%p113_p2)   ;;  %477 = vmatprep.subr.bf16.mxu1 (!%p113_p2), %v865_v3  ;;  %v871_v7 = vld [vmem:[%s1120_s1 + $0x44] ss:$28 sps:$4 sm:$0xff] (!%p113_p2)   ;;  %v874_v9 = vld [vmem:[%s1120_s1 + $0x74] ss:$28 sps:$4 sm:$0xff] (!%p113_p2)  }
   0x8   : > { %428 = vmatpush1.bf16.msra.mxu0 (!%p113_p2), %v864_v1  ;;  %v870_v6 = vld [vmem:[%s1120_s1 + $0x38] ss:$28 sps:$4 sm:$0xff] (!%p113_p2)   ;;  %478 = vmatpush1.bf16.msra.mxu1 (!%p113_p2), %v867_v4  ;;  %v873_v8 = vld [vmem:[%s1120_s1 + $0x40] ss:$28 sps:$4 sm:$0xff] (!%p113_p2)   ;;  %v876_v10 = vld [vmem:[%s1120_s1 + $0x70] ss:$28 sps:$4 sm:$0xff] (!%p113_p2)  }
   0x9   : > { %429 = vmatprep.subr.bf16.mxu0 (!%p113_p2), %v868_v5  ;;  %479 = vmatprep.subr.bf16.mxu1 (!%p113_p2), %v871_v7  ;;  %v877_v11 = vld [vmem:[%s1120_s1 + $0x7c] ss:$28 sps:$4 sm:$0xff] (!%p113_p2)   ;;  %v880_v12 = vld [vmem:[%s1120_s1 + $0xac] ss:$28 sps:$4 sm:$0xff] (!%p113_p2)   ;;  %v883_v14 = vld [vmem:[%s1120_s1 + $0xb4] ss:$28 sps:$4 sm:$0xff] (!%p113_p2)  }
   0xa   : > { %v879_v13 = vld [vmem:[%s1120_s1 + $0x78] ss:$28 sps:$4 sm:$0xff] (!%p113_p2)   ;;  %v882_v15 = vld [vmem:[%s1120_s1 + $0xa8] ss:$28 sps:$4 sm:$0xff] (!%p113_p2)   ;;  %v885_v17 = vld [vmem:[%s1120_s1 + $0xb0] ss:$28 sps:$4 sm:$0xff] (!%p113_p2)  }
   0xb   : > { %v886_v16 = vld [vmem:[%s1120_s1 + $0xe4] ss:$28 sps:$4 sm:$0xff] (!%p113_p2)   ;;  %v889_v18 = vld [vmem:[%s1120_s1 + $0xec] ss:$28 sps:$4 sm:$0xff] (!%p113_p2)   ;;  %v188_v19 = vld [vmem:[%s1120_s1 + $0x118] sm:$0xff] (!%p113_p2)  ;;  %vm398_vm1 = vcmask (!%p113_p2), 719872  }
   0xc   : > { %430 = vmatpush1.bf16.msra.mxu0 (!%p113_p2), %v870_v6  ;;  %480 = vmatpush1.bf16.msra.mxu1 (!%p113_p2), %v873_v8  ;;  %v189_v20 = vld [vmem:[%s1120_s1 + $0x120] sm:$0xff] (!%p113_p2)  ;;  %v807_v22 = vcombine.high (!%p113_p2), %v188_v19, %v188_v19  ;;  %v806_v23 = vcombine.low (!%p113_p2), %v188_v19, %v188_v19  ;;  %v899_v28 = vld [vmem:[%s1120_s1 + $0x14] ss:$28 sps:$4 sm:$0xff] (!%p113_p2)   ;;  %v903_v33 = vld [vmem:[%s1120_s1 + $0x4c] ss:$28 sps:$4 sm:$0xff] (!%p113_p2)   ;;  %vm630_vm2 = vcmask (!%p113_p2), 1046528  }
   0xd   : > { %s1123_s10 = smov (!%p134_p3, %s761_s10), 1  ;;  %431 = vmatprep.subr.bf16.mxu0 %v874_v9  ;;  %481 = vmatprep.subr.bf16.mxu1 %v877_v11  ;;  %v888_v21 = vld [vmem:[%s1120_s1 + $0xe0] ss:$28 sps:$4 sm:$0xff]   ;;  %v891_v24 = vld [vmem:[%s1120_s1 + $0xe8] ss:$28 sps:$4 sm:$0xff]   ;;  %v808_v25 = vcombine.low %v189_v20, %v189_v20  ;;  %v809_v26 = vcombine.high %v189_v20, %v189_v20  ;;  %vm643_vm3 = vcmask 1045504  }
   0xe   : > { %s852_s11 = smul.u32 12, %s1123_s10  ;;  %v407_v27 = vsel %vm405_vm0, %v806_v23, 0  ;;  %v900_v31 = vld [vmem:[%s1120_s1 + $0x18] ss:$28 sps:$4 sm:$0xff]   ;;  %v897_v32 = vld [vmem:[%s1120_s1 + $0x10] ss:$28 sps:$4 sm:$0xff]  }
   0xf   : > { %v413_v29 = vsel %vm405_vm0, %v808_v25, 0  ;;  %v904_v34 = vld [vmem:[%s1120_s1 + $0x50] ss:$28 sps:$4 sm:$0xff]   ;;  %v901_v35 = vld [vmem:[%s1120_s1 + $0x48] ss:$28 sps:$4 sm:$0xff]   ;;  %vm656_vm4 = vcmask 1044480  }
  0x10   : > { %432 = vmatpush1.bf16.msra.mxu0 %v876_v10  ;;  %482 = vmatpush1.bf16.msra.mxu1 %v879_v13  ;;  %s1018_s26 = scalar_lea.vmem %s1119_s0, %s852_s11  ;;  %v908_v36 = vld [vmem:[%s1120_s1 + $0x84] ss:$28 sps:$4 sm:$0xff]   ;;  %v912_v40 = vld [vmem:[%s1120_s1 + $0xbc] ss:$28 sps:$4 sm:$0xff]   ;;  %v916_v43 = vld [vmem:[%s1120_s1 + $0xf4] ss:$28 sps:$4 sm:$0xff]  }
  0x11   : > { %433 = vmatprep.subr.bf16.mxu0 %v880_v12  ;;  %483 = vmatprep.subr.bf16.mxu1 %v883_v14  ;;  %v896_v30 = vld [vmem:[%s1018_s26] sm:$0xff]   ;;  %v905_v37 = vld [vmem:[%s1018_s26 + $0x8] ss:$0 sps:$4 sm:$0x77]   ;;  %v910_v42 = vld [vmem:[%s1120_s1 + $0xb8] ss:$28 sps:$4 sm:$0xff]  }
  0x12   : > { %v909_v38 = vld [vmem:[%s1120_s1 + $0x88] ss:$28 sps:$4 sm:$0xff]   ;;  %v906_v39 = vld [vmem:[%s1120_s1 + $0x80] ss:$28 sps:$4 sm:$0xff]   ;;  %v917_v45 = vld [vmem:[%s1120_s1 + $0xf8] ss:$28 sps:$4 sm:$0xff]  }
  0x13   : > { %v913_v41 = vld [vmem:[%s1120_s1 + $0xc0] ss:$28 sps:$4 sm:$0xff]   ;;  %v190_v44 = vld [vmem:[%s1120_s1 + $0x128] sm:$0xff]  ;;  %v920_v49 = vld [vmem:[%s1120_s1 + $0x130] ss:$0 sps:$4 sm:$0xff]   ;;  %vm681_vm5 = vcmask 1042432  }
  0x14   : > { %434 = vmatpush1.bf16.msra.mxu0 %v882_v15  ;;  %484 = vmatpush1.bf16.msra.mxu1 %v885_v17  ;;  %v914_v46 = vld [vmem:[%s1120_s1 + $0xf0] ss:$28 sps:$4 sm:$0xff]   ;;  %v811_v47 = vcombine.high %v190_v44, %v190_v44  ;;  %v810_v48 = vcombine.low %v190_v44, %v190_v44  ;;  %v425_v51 = vsel %vm405_vm0, %v920_v49, 0  ;;  %vm694_vm6 = vcmask 1041408   ;;  %s826_s15 = sshll.u32 %s1123_s10, 4 }
  0x15   : > { %435 = vmatprep.subr.bf16.mxu0 %v886_v16  ;;  %485 = vmatprep.subr.bf16.mxu1 %v889_v18  ;;  %s143_s18 = scalar_lea.vmem %s1121_s2, %s826_s15 }
  0x16   : > { %v419_v50 = vsel %vm405_vm0, %v810_v48, 0 }
  0x18   : > { %436 = vmatpush1.bf16.msra.mxu0 %v888_v21  ;;  %486 = vmatpush1.bf16.msra.mxu1 %v891_v24 }
  0x19   : > { %813 = vmatprep.subr.msk.bf16.mxu0 %vm405_vm0, %v807_v22  ;;  %816 = vmatprep.subr.msk.bf16.mxu1 %vm405_vm0, %v809_v26 }
  0x1c   : > { %438 = vmatpush1.bf16.msra.mxu0 %v407_v27  ;;  %488 = vmatpush1.bf16.msra.mxu1 %v413_v29 }
  0x1d   : > { %528 = vmatprep.subr.bf16.mxu0 %v899_v28  ;;  %835 = vmatprep.subr.bf16.mxu1 %v900_v31 }
  0x1f   : > { %814 = vmatmul.mubr.msk.bf16.vlgmr.msra.gmra.mrb[0].mxu0 %vm398_vm1, %v896_v30  ;;  %817 = vmatmul.mubr.msk.bf16.vlgmr.msra.gmra.mrb[0].mxu1 %vm398_vm1, %v896_v30 }
  0x20   : > { %529 = vmatpush1.bf16.msra.mxu0 %v897_v32  ;;  %469 = vmatprep.mubr.bf16.mxu0 %v929_v2 }
  0x21   : > { %530 = vmatprep.subr.bf16.mxu0 %v903_v33  ;;  %836 = vmatpush3.bf16.msra.mxu1 %v900_v31 }
  0x22   : > { %519 = vmatprep.mubr.bf16.mxu1 %v929_v2  ;;  %837 = vmatprep.subr.bf16.mxu1 %v904_v34 }
  0x24   : > { %531 = vmatpush1.bf16.msra.mxu0 %v901_v35 }
  0x25   : > { %532 = vmatprep.subr.bf16.mxu0 %v908_v36  ;;  %838 = vmatpush3.bf16.msra.mxu1 %v904_v34 }
  0x26   : > { %839 = vmatprep.subr.bf16.mxu1 %v909_v38 }
  0x27   : > { %815 = vmatmul.mubr.msk.bf16.gmra.mrb[4].mxu0 %vm398_vm1, %v905_v37  ;;  %818 = vmatmul.mubr.msk.bf16.gmra.mrb[4].mxu1 %vm398_vm1, %v905_v37 }
  0x28   : > { %533 = vmatpush1.bf16.msra.mxu0 %v906_v39  ;;  %560 = vmatprep.mubr.bf16.mxu0 %v929_v2 }
  0x29   : > { %534 = vmatprep.subr.bf16.mxu0 %v912_v40  ;;  %840 = vmatpush3.bf16.msra.mxu1 %v909_v38 }
  0x2a   : > { %847 = vmatprep.mubr.msk.bf16.mxu1 %vm398_vm1, %v896_v30  ;;  %841 = vmatprep.subr.bf16.mxu1 %v913_v41 }
  0x2c   : > { %535 = vmatpush1.bf16.msra.mxu0 %v910_v42 }
  0x2d   : > { %536 = vmatprep.subr.bf16.mxu0 %v916_v43  ;;  %842 = vmatpush3.bf16.msra.mxu1 %v913_v41 }
  0x2e   : > { %843 = vmatprep.subr.bf16.mxu1 %v917_v45 }
  0x30   : > { %537 = vmatpush1.bf16.msra.mxu0 %v914_v46 }
  0x31   : > { %819 = vmatprep.subr.msk.bf16.mxu0 %vm405_vm0, %v811_v47  ;;  %844 = vmatpush3.bf16.msra.mxu1 %v917_v45 }
  0x32   : > { %851 = vmatprep.subr.msk.bf16.mxu1 %vm405_vm0, %v920_v49 }
  0x34   : > { %539 = vmatpush1.bf16.msra.mxu0 %v419_v50 }
  0x35   : > { %846 = vmatpush3.bf16.msra.mxu1 %v425_v51 }
  0x37   : > { %820 = vmatmul.mubr.msk.bf16.vlgmr.msra.gmra.mrb[8].mxu0 %vm398_vm1, %v896_v30 }
  0x38   : > { %570 = vmatprep.mubr.bf16.mxu0 %v929_v2  ;;  %848 = vmatmul.mubr.msk.bf16.vlgmr.msra.gmra.mrb[8].mxu1 %vm398_vm1, %v905_v37 }
  0x3f   : > { %821 = vmatmul.mubr.msk.bf16.gmra.mrb[12].mxu0 %vm398_vm1, %v905_v37 }
  0xf2   : > { %v461_v52 = vpop.f32.mrb[0].mxu0  ;;  %v511_v55 = vpop.f32.mrb[0].mxu1 }
  0xf3   : > { %v463_v53 = vpop.f32.mrb[1].mxu0  ;;  %v644_v57 = vrot.slane %v511_v55, 2  ;;  %v513_v58 = vpop.f32.mrb[1].mxu1 }
  0xf4   : > { %v465_v54 = vpop.f32.mrb[2].mxu0  ;;  %v631_v59 = vrot.slane %v463_v53, 1  ;;  %v657_v61 = vrot.slane %v513_v58, 3  ;;  %v515_v62 = vpop.f32.mrb[2].mxu1 }
  0xf5   : > { %v467_v56 = vpop.f32.mrb[3].mxu0  ;;  %v645_v63 = vrot.slane %v515_v62, 2  ;;  %v517_v0 = vpop.f32.mrb[3].mxu1 }
  0xf6   : > { %v632_v60 = vrot.slane %v467_v56, 1  ;;  %v658_v2 = vrot.slane %v517_v0, 3 }
  0xf7   : > { %v646_v4 = vsel %vm643_vm3, %v644_v57, %v645_v63 }
  0xf8   : > { %v633_v1 = vsel %vm630_vm2, %v631_v59, %v632_v60  ;;  %v659_v5 = vsel %vm656_vm4, %v657_v61, %v658_v2 }
  0xf9   : > { %v638_v3 = vadd.f32 %v633_v1, %v461_v52 }
  0xfa   : > { %v471_v6 = vpop.f32.mrb[4].mxu0  ;;  %v521_v10 = vpop.f32.mrb[4].mxu1 }
  0xfb   : > { %v651_v7 = vadd.f32 %v646_v4, %v638_v3  ;;  %v472_v8 = vpop.f32.mrb[5].mxu0  ;;  %v647_v13 = vrot.slane %v521_v10, 2  ;;  %v523_v14 = vpop.f32.mrb[5].mxu1 }
  0xfc   : > { %v634_v9 = vrot.slane %v472_v8, 1  ;;  %v474_v11 = vpop.f32.mrb[6].mxu0  ;;  %v660_v17 = vrot.slane %v523_v14, 3  ;;  %v525_v18 = vpop.f32.mrb[6].mxu1 }
  0xfd   : > { %v664_v12 = vadd.f32 %v659_v5, %v651_v7  ;;  %v475_v15 = vpop.f32.mrb[7].mxu0  ;;  %v648_v20 = vsel %vm643_vm3, %v645_v63, %v647_v13  ;;  %v526_v21 = vpop.f32.mrb[7].mxu1 }
  0xfe   : > { %v635_v16 = vsel %vm630_vm2, %v632_v60, %v634_v9  ;;  %v661_v22 = vsel %vm656_vm4, %v658_v2, %v660_v17 }
  0xff   : > { %v639_v19 = vadd.f32 %v635_v16, %v465_v54 }
 0x101   : > { %v652_v23 = vadd.f32 %v648_v20, %v639_v19 }
 0x103   : > { %v665_v24 = vadd.f32 %v661_v22, %v652_v23 }
 0x10a   : > { %v562_v25 = vpop.f32.mrb[8].mxu0 }
 0x10b   : > { %v564_v26 = vpop.f32.mrb[9].mxu0  ;;  %v849_v28 = vpop.f32.mrb[8].mxu1  ;;  %v669_v29 = vrot.slane %v562_v25, 4 }
 0x10c   : > { %v566_v27 = vpop.f32.mrb[10].mxu0  ;;  %v613_v32 = vpop.f32.mrb[9].mxu1  ;;  %v682_v33 = vrot.slane %v564_v26, 5  ;;  %v698_v35 = vrot.slane %v849_v28, 6 }
 0x10d   : > { %v670_v30 = vrot.slane %v566_v27, 4  ;;  %v568_v31 = vpop.f32.mrb[11].mxu0  ;;  %v695_v36 = vrot.slane %v613_v32, 6  ;;  %v850_v37 = vpop.f32.mrb[10].mxu1 }
 0x10e   : > { %v683_v34 = vrot.slane %v568_v31, 5  ;;  %v616_v39 = vpop.f32.mrb[11].mxu1 }
 0x10f   : > { %v671_v38 = vsel %vm405_vm0, %v669_v29, %v670_v30  ;;  %v696_v42 = vrot.slane %v616_v39, 6 }
 0x110   : > { %v676_v40 = vadd.f32 %v671_v38, %v664_v12  ;;  %v684_v41 = vsel %vm681_vm5, %v682_v33, %v683_v34 }
 0x111   : > { %v697_v44 = vsel %vm694_vm6, %v695_v36, %v696_v42  ;;  %v699_v45 = vsel %vm694_vm6, %v696_v42, %v698_v35 }
 0x112   : > { %v689_v43 = vadd.f32 %v684_v41, %v676_v40  ;;  %v572_v46 = vpop.f32.mrb[12].mxu0 }
 0x113   : > { %v672_v47 = vrot.slane %v572_v46, 4  ;;  %v574_v48 = vpop.f32.mrb[13].mxu0 }
 0x114   : > { %v702_v49 = vadd.f32 %v697_v44, %v689_v43  ;;  %v685_v50 = vrot.slane %v574_v48, 5  ;;  %v576_v51 = vpop.f32.mrb[14].mxu0 }
 0x115   : > { %v673_v52 = vsel %vm405_vm0, %v670_v30, %v672_v47  ;;  %v577_v53 = vpop.f32.mrb[15].mxu0 }
 0x116   : > { %704 = vst [vmem:[%s143_s18] sm:$0xff] %v702_v49  ;;  %v677_v54 = vadd.f32 %v673_v52, %v665_v24  ;;  %v686_v55 = vsel %vm681_vm5, %v683_v34, %v685_v50 }
 0x118   : > { %v690_v56 = vadd.f32 %v686_v55, %v677_v54 }
 0x11a   : > { %v703_v57 = vadd.f32 %v699_v45, %v690_v56 }
 0x11c   : > { %705 = vst [vmem:[%s143_s18 + $0x8] sm:$0xff] %v703_v57 }
 0x11d PF: > { %s12_s9 = sadd.s32 1, %s927_s9  }
 0x11e   : > { %p9_p4 = scmp.ge.s32.totalorder %s12_s9, 4  }
 0x120   :  { %11 = sbr.rel (!%p9_p4) target bundleno = 1 (0x1), region = 58 }

</bundles_post_ra>
